<compile_context>
chip_gen: v6e
topology: v6e:2x2x1
jax: 0.10.0
libtpu: 0.0.40
codegen_flags: <defaults>
</compile_context>

<pallas_src>
import math

import jax
import jax.numpy as jnp
from jax import lax
from jax.experimental import pallas as pl
from jax.experimental.pallas import tpu as pltpu


def _round_up(a: int, m: int) -> int:
    return ((a + m - 1) // m) * m


def three_layer_model_forward(x, w1, b1, w2, b2, *, block_b=8192):
    """x: [B, 8] -> returns [B]  (matches torch's squeeze(-1))."""
    B = x.shape[0]

    # ---- batch tile selection (per-generation friendly) -------------------
    block_b = max(1024, _round_up(block_b, 1024))
    B128 = _round_up(B, 128)
    if B128 <= 1024:
        TB = B128                                   # single small tile
    else:
        n_tiles = pl.cdiv(B128, block_b)
        if n_tiles == 1:
            n_tiles = 2                             # keep both v7x TCs busy
        TB = _round_up(pl.cdiv(B128, n_tiles), 1024)
    CHUNK = min(1024, TB)                           # TB % CHUNK == 0 by construction
    n_chunks = TB // CHUNK
    B_pad = pl.cdiv(B128, TB) * TB
    grid_b = B_pad // TB

    # ---- wrapper-side layout plumbing (tiny / one-off) ---------------------
    x_pad = jnp.pad(x.astype(jnp.float32), ((0, B_pad - B), (0, 0))).T  # [8, B_pad]
    xT_aug = jnp.concatenate(
        [x_pad,
         jnp.ones((1, B_pad), jnp.float32),          # ones row -> folds b1
         jnp.zeros((7, B_pad), jnp.float32)],        # pad K to 16 (sublane mult of 8)
        axis=0)                                      # [16, B_pad]
    w1_aug = jnp.concatenate(
        [w1.astype(jnp.float32),
         b1.reshape(128, 1).astype(jnp.float32),
         jnp.zeros((128, 7), jnp.float32)],
        axis=1)                                      # [128, 16]
    w2_col = w2.reshape(128, 1).astype(jnp.float32)  # [128, 1]
    b2_2d = b2.reshape(1, 1).astype(jnp.float32)     # [1, 1]

    def mlp_kernel(xT_ref, w1a_ref, w2_ref, b2_ref, o_ref):
        """xT_ref [16,TB], w1a_ref [128,16], w2_ref [128,1], b2_ref [1,1],
        o_ref [1,TB].  Processes the batch tile in lane-dense CHUNK slices."""
        w1a = w1a_ref[...]            # resident, tiny
        w2c = w2_ref[...]             # [128, 1]
        b2c = b2_ref[...]             # [1, 1]

        def body(c, carry):
            start = pl.multiple_of(c * CHUNK, CHUNK)
            x_c = xT_ref[:, pl.ds(start, CHUNK)]                    # [16, CHUNK]
            # Layer 1 + bias on the MXU (bias folded via the ones row).
            h = jnp.dot(w1a, x_c, preferred_element_type=jnp.float32)  # [128, CHUNK]
            h = jnp.maximum(h, 0.0)                                  # ReLU (VPU)
            # Layer 2: VPU multiply + sublane reduce (no N=1 MXU matmul).
            y = jnp.sum(h * w2c, axis=0, keepdims=True) + b2c        # [1, CHUNK]
            o_ref[:, pl.ds(start, CHUNK)] = y
            return carry

        lax.fori_loop(0, n_chunks, body, None, unroll=True)

    flops = 2 * B_pad * 16 * 128 + 2 * B_pad * 128
    bytes_accessed = 4 * (16 * B_pad + B_pad + 128 * 16 + 128 + 1)

    out = pl.pallas_call(
        mlp_kernel,
        out_shape=jax.ShapeDtypeStruct((1, B_pad), jnp.float32),
        grid_spec=pltpu.PrefetchScalarGridSpec(
            num_scalar_prefetch=0,
            grid=(grid_b,),
            in_specs=[
                pl.BlockSpec((16, TB), lambda i: (0, i)),     # xT_aug tile
                pl.BlockSpec((128, 16), lambda i: (0, 0)),    # W1_aug (resident)
                pl.BlockSpec((128, 1), lambda i: (0, 0)),     # W2 column
                pl.BlockSpec((1, 1), lambda i: (0, 0)),       # b2
            ],
            out_specs=pl.BlockSpec((1, TB), lambda i: (0, i)),
        ),
        compiler_params=pltpu.CompilerParams(
            dimension_semantics=("parallel",),
            vmem_limit_bytes=32 * 1024 * 1024,
        ),
        cost_estimate=pl.CostEstimate(
            flops=flops, transcendentals=0, bytes_accessed=bytes_accessed
        ),
    )(xT_aug, w1_aug, w2_col, b2_2d)

    return out[0, :B]  # drop padding + squeeze(-1)


def init_params(key):
    """Deterministic init mimicking torch.nn.Linear (uniform +/- 1/sqrt(fan_in))."""
    k1, k2, k3, k4 = jax.random.split(key, 4)
    bound1 = 1.0 / math.sqrt(8.0)
    w1 = jax.random.uniform(k1, (128, 8), jnp.float32, -bound1, bound1)
    b1 = jax.random.uniform(k2, (128,), jnp.float32, -bound1, bound1)
    bound2 = 1.0 / math.sqrt(128.0)
    w2 = jax.random.uniform(k3, (1, 128), jnp.float32, -bound2, bound2)
    b2 = jax.random.uniform(k4, (1,), jnp.float32, -bound2, bound2)
    return w1, b1, w2, b2


if __name__ == "__main__":
    key = jax.random.PRNGKey(0)
    kx, kp = jax.random.split(key)

    B = 8  # small batch (padded to one 128-wide lane tile inside the wrapper)
    x = jax.random.normal(kx, (B, 8), jnp.float32)
    w1, b1, w2, b2 = init_params(kp)

    y = three_layer_model_forward(x, w1, b1, w2, b2)
    y = jax.block_until_ready(y)

    # Reference check in plain JAX (same math as the torch forward).
    ref = jnp.maximum(x @ w1.T + b1, 0.0) @ w2.T + b2
    ref = ref[:, 0]
    assert y.shape == (B,)
    assert jnp.allclose(y, ref, atol=1e-5, rtol=1e-5)

    print("KERNEL_OK")
</pallas_src>

<mosaic_0001>
module attributes {stable_mosaic.version = 11 : i64} {
  func.func @mlp_kernel(%arg0: i32, %arg1: memref<16x128xf32, #tpu.memory_space<vmem>>, %arg2: memref<128x16xf32, #tpu.memory_space<vmem>>, %arg3: memref<128x1xf32, #tpu.memory_space<vmem>>, %arg4: memref<1x1xf32, #tpu.memory_space<vmem>>, %arg5: memref<1x128xf32, #tpu.memory_space<vmem>>) attributes {dimension_semantics = [#tpu.dimension_semantics<parallel>], iteration_bounds = array<i64: 1>, scalar_prefetch = 0 : i64, scratch_operands = 0 : i64, tpu.core_type = #tpu.core_type<tc>, window_params = [{transform_indices = @transform_0, window_bounds = array<i64: 16, 128>}, {pipeline_mode = #tpu.pipeline_mode<synchronous>, transform_indices = @transform_1, window_bounds = array<i64: 128, 16>}, {pipeline_mode = #tpu.pipeline_mode<synchronous>, transform_indices = @transform_2, window_bounds = array<i64: 128, 1>}, {pipeline_mode = #tpu.pipeline_mode<synchronous>, transform_indices = @transform_3, window_bounds = array<i64: 1, 1>}, {transform_indices = @transform_4, window_bounds = array<i64: 1, 128>}]} {
    %c0 = arith.constant 0 : index
    %c0_0 = arith.constant 0 : index
    %0 = vector.load %arg2[%c0, %c0_0] : memref<128x16xf32, #tpu.memory_space<vmem>>, vector<128x16xf32>
    %c0_1 = arith.constant 0 : index
    %c0_2 = arith.constant 0 : index
    %1 = vector.load %arg3[%c0_1, %c0_2] : memref<128x1xf32, #tpu.memory_space<vmem>>, vector<128x1xf32>
    %c0_3 = arith.constant 0 : index
    %c0_4 = arith.constant 0 : index
    %2 = vector.load %arg4[%c0_3, %c0_4] : memref<1x1xf32, #tpu.memory_space<vmem>>, vector<1x1xf32>
    %c0_i32 = arith.constant 0 : i32
    %c128_i32 = arith.constant 128 : i32
    %3 = arith.muli %c0_i32, %c128_i32 : i32
    %4 = tpu.assume_multiple %3, 128 : i32
    %c0_5 = arith.constant 0 : index
    %5 = arith.index_cast %4 : i32 to index
    %6 = vector.load %arg1[%c0_5, %5] : memref<16x128xf32, #tpu.memory_space<vmem>>, vector<16x128xf32>
    %cst = arith.constant dense<0.000000e+00> : vector<128x128xf32>
    %7 = tpu.matmul %0, %6, %cst {dimension_numbers = #tpu.dot_dimension_numbers<[1], [0], [0], [1], [0, 0, 1, 1], [], []>} : vector<128x16xf32>, vector<16x128xf32>, vector<128x128xf32> -> vector<128x128xf32>
    %cst_6 = arith.constant 0.000000e+00 : f32
    %8 = vector.broadcast %cst_6 : f32 to vector<128x128xf32>
    %9 = arith.maximumf %7, %8 : vector<128x128xf32>
    %10 = vector.broadcast %1 : vector<128x1xf32> to vector<128x128xf32>
    %11 = arith.mulf %9, %10 : vector<128x128xf32>
    %cst_7 = arith.constant dense<0.000000e+00> : vector<128xf32>
    %12 = vector.multi_reduction <add>, %11, %cst_7 [0] : vector<128x128xf32> to vector<128xf32>
    %13 = vector.shape_cast %12 : vector<128xf32> to vector<1x128xf32>
    %14 = vector.broadcast %2 : vector<1x1xf32> to vector<1x128xf32>
    %15 = arith.addf %13, %14 : vector<1x128xf32>
    %c0_8 = arith.constant 0 : index
    %16 = arith.index_cast %4 : i32 to index
    %17 = vector.load %arg5[%c0_8, %16] : memref<1x128xf32, #tpu.memory_space<vmem>>, vector<1x128xf32>
    tpu.vector_store %arg5[%c0_8, %16], %15 {strides = array<i32>} : memref<1x128xf32, #tpu.memory_space<vmem>>, vector<1x128xf32>,
    %c1_i32 = arith.constant 1 : i32
    return
  }
  func.func @transform_0(%arg0: i32) -> (i32, i32) {
    %c0_i32 = arith.constant 0 : i32
    %c0_i32_0 = arith.constant 0 : i32
    return %c0_i32, %arg0 : i32, i32
  }
  func.func @transform_1(%arg0: i32) -> (i32, i32) {
    %c0_i32 = arith.constant 0 : i32
    %c0_i32_0 = arith.constant 0 : i32
    %c0_i32_1 = arith.constant 0 : i32
    return %c0_i32, %c0_i32_0 : i32, i32
  }
  func.func @transform_2(%arg0: i32) -> (i32, i32) {
    %c0_i32 = arith.constant 0 : i32
    %c0_i32_0 = arith.constant 0 : i32
    %c0_i32_1 = arith.constant 0 : i32
    return %c0_i32, %c0_i32_0 : i32, i32
  }
  func.func @transform_3(%arg0: i32) -> (i32, i32) {
    %c0_i32 = arith.constant 0 : i32
    %c0_i32_0 = arith.constant 0 : i32
    %c0_i32_1 = arith.constant 0 : i32
    return %c0_i32, %c0_i32_0 : i32, i32
  }
  func.func @transform_4(%arg0: i32) -> (i32, i32) {
    %c0_i32 = arith.constant 0 : i32
    %c0_i32_0 = arith.constant 0 : i32
    return %c0_i32, %arg0 : i32, i32
  }
}

</mosaic_0001>

<bundles_post_ra>
// kernel: tpu_custom_call.1
= control target key start
LH: loop header
LB: loop body
LE: loop exit
PB: predicated region body
PF: predicated region fallthrough
CT: control target
= control target key end

     0   :  { %s650_s0 = inlined_call_operand.vmem [shape: f32[16,128], index: 0, kind: input, shape index: {}]   ;;  %s651_s1 = inlined_call_operand.vmem [shape: f32[128,16], index: 1, kind: input, shape index: {}]   ;;  %s652_s2 = inlined_call_operand.vmem [shape: f32[128,1], index: 2, kind: input, shape index: {}]   ;;  %s653_s3 = inlined_call_operand.<no memory space> [shape: f32[1,1], index: 3, kind: input, shape index: {}]   ;;  %s654_s4 = inlined_call_operand.hbm [shape: f32[1,128], index: 4, kind: output, shape index: {}]  }
   0x1   :  { %v9_v0 = vstv %s653_s3 }
   0x2   :  { %10 = vst [vmem:[#allocation2] sm:$0x1] %v9_v0 }
   0x3   :  { %v54_v1 = vld [vmem:[%s650_s0 + $0x8] sm:$0xff]  ;;  %v53_v2 = vld [vmem:[%s650_s0] sm:$0xff]  ;;  %vm55_vm0 = vcmask 130048   ;;  %v22_v7 = vld [vmem:[%s651_s1 + $0x10] sm:$0xff]  ;;  %v499_v15 = vmov 0  }
   0x4   :  { %441 = vmatprep.subr.mxu0 %v54_v1  ;;  %469 = vmatprep.subr.mxu1 %v54_v1  ;;  %v20_v3 = vld [vmem:[%s651_s1] sm:$0xff]  ;;  %v21_v5 = vld [vmem:[%s651_s1 + $0x8] sm:$0xff]  ;;  %v30_v8 = vld [vmem:[%s651_s1 + $0x50] sm:$0xff] }
   0x5   :  { %442 = vmatpush3.msra.mxu0 %v54_v1  ;;  %471 = vmatpush3.msra.mxu1 %v54_v1  ;;  %v28_v4 = vld [vmem:[%s651_s1 + $0x40] sm:$0xff]  ;;  %v29_v6 = vld [vmem:[%s651_s1 + $0x48] sm:$0xff]  ;;  %v38_v10 = vld [vmem:[%s652_s2 + $0x10] sm:$0xff] }
   0x6   :  { %443 = vmatprep.subr.mxu0 %v53_v2  ;;  %470 = vmatprep.subr.mxu1 %v53_v2  ;;  %v36_v9 = vld [vmem:[%s652_s2] sm:$0xff]  ;;  %v23_v11 = vld [vmem:[%s651_s1 + $0x18] sm:$0xff]  ;;  %v37_v16 = vld [vmem:[%s652_s2 + $0x8] sm:$0xff] }
   0x7   :  { %444 = vmatpush3.msra.mxu0 %v53_v2  ;;  %472 = vmatpush3.msra.mxu1 %v53_v2  ;;  %v31_v12 = vld [vmem:[%s651_s1 + $0x58] sm:$0xff]  ;;  %v24_v13 = vld [vmem:[%s651_s1 + $0x20] sm:$0xff]  ;;  %v25_v18 = vld [vmem:[%s651_s1 + $0x28] sm:$0xff] }
   0x8   :  { %445 = vmatprep.mubr.msk.f32.mxu0 %vm55_vm0, %v20_v3  ;;  %457 = vmatprep.mubr.msk.f32.mxu1 %vm55_vm0, %v28_v4  ;;  %v32_v14 = vld [vmem:[%s651_s1 + $0x60] sm:$0xff]  ;;  %v39_v17 = vld [vmem:[%s652_s2 + $0x18] sm:$0xff]  ;;  %v33_v19 = vld [vmem:[%s651_s1 + $0x68] sm:$0xff] }
   0x9   :  { %446 = vmatmul.mubr.msk.f32.vlgmr.msra.gmra.mxu0 %vm55_vm0, %v21_v5  ;;  %458 = vmatmul.mubr.msk.f32.vlgmr.msra.gmra.mxu1 %vm55_vm0, %v29_v6 }
   0xa   :  { %448 = vmatprep.mubr.msk.f32.mxu0 %vm55_vm0, %v22_v7  ;;  %460 = vmatprep.mubr.msk.f32.mxu1 %vm55_vm0, %v30_v8 }
   0xb   :  { %475 = vset.pattern.permute.xlu0 %v499_v15  ;;  %476 = vset.pattern.permute.xlu1 %v499_v15 }
   0xc   :  { %267 = vperm.xlu0 %475, %v36_v9   ;;  %277 = vperm.xlu1 %476, %v38_v10  }
   0xd   :  { %449 = vmatmul.mubr.msk.f32.gmra.mxu0 %vm55_vm0, %v23_v11  ;;  %461 = vmatmul.mubr.msk.f32.gmra.mxu1 %vm55_vm0, %v31_v12 }
   0xe   :  { %451 = vmatprep.mubr.msk.f32.mxu0 %vm55_vm0, %v24_v13  ;;  %463 = vmatprep.mubr.msk.f32.mxu1 %vm55_vm0, %v32_v14 }
   0xf   :  { %11 = vsyncpa [#allocation4], 0  ;;  %v26_v20 = vld [vmem:[%s651_s1 + $0x30] sm:$0xff]  ;;  %v40_v22 = vld [vmem:[%s652_s2 + $0x20] sm:$0xff] }
  0x10   :  { %v34_v21 = vld [vmem:[%s651_s1 + $0x70] sm:$0xff]  ;;  %272 = vperm.xlu0 %475, %v37_v16   ;;  %282 = vperm.xlu1 %476, %v39_v17   ;;  %v41_v23 = vld [vmem:[%s652_s2 + $0x28] sm:$0xff]  ;;  %v27_v24 = vld [vmem:[%s651_s1 + $0x38] sm:$0xff] }
  0x11   :  { %452 = vmatmul.mubr.msk.f32.gmra.mxu0 %vm55_vm0, %v25_v18  ;;  %464 = vmatmul.mubr.msk.f32.gmra.mxu1 %vm55_vm0, %v33_v19  ;;  %v35_v25 = vld [vmem:[%s651_s1 + $0x78] sm:$0xff]  ;;  %v42_v26 = vld [vmem:[%s652_s2 + $0x30] sm:$0xff]  ;;  %v44_v28 = vld [vmem:[%s652_s2 + $0x40] sm:$0xff] }
  0x12   :  { %454 = vmatprep.mubr.msk.f32.mxu0 %vm55_vm0, %v26_v20  ;;  %466 = vmatprep.mubr.msk.f32.mxu1 %vm55_vm0, %v34_v21  ;;  %v43_v27 = vld [vmem:[%s652_s2 + $0x38] sm:$0xff]  ;;  %v45_v29 = vld [vmem:[%s652_s2 + $0x48] sm:$0xff]  ;;  %v46_v30 = vld [vmem:[%s652_s2 + $0x50] sm:$0xff] }
  0x13   :  { %v47_v31 = vld [vmem:[%s652_s2 + $0x58] sm:$0xff]  ;;  %v48_v32 = vld [vmem:[%s652_s2 + $0x60] sm:$0xff]  ;;  %v49_v33 = vld [vmem:[%s652_s2 + $0x68] sm:$0xff] }
  0x14   :  { %287 = vperm.xlu0 %475, %v40_v22   ;;  %292 = vperm.xlu1 %476, %v41_v23   ;;  %v50_v34 = vld [vmem:[%s652_s2 + $0x70] sm:$0xff]  ;;  %v51_v35 = vld [vmem:[%s652_s2 + $0x78] sm:$0xff]  ;;  %v52_v36 = vld [vmem:[#allocation2] sm:$0x1]  ;;  %s500_s2 = smov [#allocation3]  }
  0x15   :  { %455 = vmatmul.mubr.msk.f32.gmra.mxu0 %vm55_vm0, %v27_v24  ;;  %467 = vmatmul.mubr.msk.f32.gmra.mxu1 %vm55_vm0, %v35_v25  ;;  %s399_s26 = sshll.u32 %s500_s2, 4  ;;  %s400_s26 = int_to_ptr.vmem [resolvable:$true] %s399_s26 }
  0x16   :  { %s477_s27 = scalar_lea.vmem %s400_s26, 16  ;;  %s481_s28 = scalar_lea.vmem %s400_s26, 32 }
  0x17   :  { %p478_p0 = scmp.ne.s32.totalorder %s400_s26, %s477_s27  ;;  %p482_p1 = scmp.lt.s32.totalorder %s400_s26, %s400_s26 }
  0x18   :  { %297 = vperm.xlu0 %475, %v42_v26   ;;  %302 = vperm.xlu1 %476, %v43_v27   ;;  %p483_p2 = scmp.lt.s32.totalorder %s481_s28, %s477_s27 }
  0x1a   :  { %p484_p3 = por %p483_p2, %p482_p1 }
  0x1c   :  { %307 = vperm.xlu0 %475, %v44_v28   ;;  %312 = vperm.xlu1 %476, %v45_v29   ;;  %p485_p4 = pnand %p484_p3, %p478_p0 }
  0x20   :  { %317 = vperm.xlu0 %475, %v46_v30   ;;  %322 = vperm.xlu1 %476, %v47_v31  }
  0x24   :  { %327 = vperm.xlu0 %475, %v48_v32   ;;  %332 = vperm.xlu1 %476, %v49_v33  }
  0x28   :  { %337 = vperm.xlu0 %475, %v50_v34   ;;  %342 = vperm.xlu1 %476, %v51_v35  }
  0x2c   :  { %384 = vperm.xlu0 %475, %v52_v36  }
  0x87   :  { %v268_v37 = vpop.permute.xlu0 %267  ;;  %v278_v38 = vpop.permute.xlu1 %277 }
  0x8b   :  { %v273_v39 = vpop.permute.xlu0 %272  ;;  %v283_v40 = vpop.permute.xlu1 %282 }
  0x8f   :  { %v288_v43 = vpop.permute.xlu0 %287  ;;  %v293_v46 = vpop.permute.xlu1 %292 }
  0x93   :  { %v298_v53 = vpop.permute.xlu0 %297  ;;  %v303_v58 = vpop.permute.xlu1 %302 }
  0x97   :  { %v308_v4 = vpop.permute.xlu0 %307  ;;  %v313_v13 = vpop.permute.xlu1 %312 }
  0x9b   :  { %v318_v21 = vpop.permute.xlu0 %317  ;;  %v323_v25 = vpop.permute.xlu1 %322 }
  0x9f   :  { %v328_v33 = vpop.permute.xlu0 %327 }
  0xc9   :  { %v447_v41 = vpop.f32.mrf.mxu0  ;;  %v459_v42 = vpop.f32.mrf.mxu1 }
  0xca   :  { %v250_v47 = vmax.f32 %v447_v41, 0.0  ;;  %v258_v18 = vmax.f32 %v459_v42, 0.0 }
  0xcb   :  { %v170_v44 = vpop.f32.mrf.mxu0  ;;  %v210_v45 = vpop.f32.mrf.mxu1 }
  0xcc   :  { %v249_v48 = vmax.f32 %v170_v44, 0.0  ;;  %v346_v54 = vmul.f32 %v273_v39, %v250_v47  ;;  %v257_v14 = vmax.f32 %v210_v45, 0.0  ;;  %v354_v27 = vmul.f32 %v313_v13, %v258_v18  ;;  %v338_v45 = vpop.permute.xlu0 %337 }
  0xcd   :  { %v450_v49 = vpop.f32.mrf.mxu0  ;;  %v462_v51 = vpop.f32.mrf.mxu1 }
  0xce   :  { %v345_v50 = vmul.f32 %v268_v37, %v249_v48  ;;  %v252_v55 = vmax.f32 %v450_v49, 0.0  ;;  %v353_v22 = vmul.f32 %v308_v4, %v257_v14  ;;  %v260_v28 = vmax.f32 %v462_v51, 0.0 }
  0xcf   :  { %v180_v52 = vpop.f32.mrf.mxu0  ;;  %v220_v61 = vpop.f32.mrf.mxu1  ;;  %v387_v51 = vlaneseq }
  0xd0   :  { %v251_v56 = vmax.f32 %v180_v52, 0.0  ;;  %v361_v59 = vadd.f32 %v346_v54, %v345_v50  ;;  %v348_v63 = vmul.f32 %v283_v40, %v252_v55  ;;  %v259_v23 = vmax.f32 %v220_v61, 0.0 }
  0xd1   :  { %v453_v57 = vpop.f32.mrf.mxu0  ;;  %v465_v7 = vpop.f32.mrf.mxu1  ;;  %v356_v35 = vmul.f32 %v323_v25, %v260_v28  ;;  %v388_v54 = vshrl.u32 %v387_v51, 7 }
  0xd2   :  { %v347_v60 = vmul.f32 %v278_v38, %v251_v56  ;;  %v254_v1 = vmax.f32 %v453_v57, 0.0  ;;  %v355_v30 = vmul.f32 %v318_v21, %v259_v23  ;;  %v262_v36 = vmax.f32 %v465_v7, 0.0  ;;  %v333_v38 = vpop.permute.xlu1 %332 }
  0xd3   :  { %v190_v62 = vpop.f32.mrf.mxu0  ;;  %v230_v17 = vpop.f32.mrf.mxu1  ;;  %v389_v57 = vsub.s32 0, %v388_v54 }
  0xd4   :  { %v362_v0 = vadd.f32 %v361_v59, %v347_v60  ;;  %v253_v2 = vmax.f32 %v190_v62, 0.0  ;;  %v350_v9 = vmul.f32 %v293_v46, %v254_v1  ;;  %v261_v31 = vmax.f32 %v230_v17, 0.0  ;;  %v385_v59 = vpop.permute.xlu0 %384 }
  0xd5   :  { %v456_v3 = vpop.f32.mrf.mxu0  ;;  %v468_v26 = vpop.f32.mrf.mxu1  ;;  %v358_v42 = vmul.f32 %v333_v38, %v262_v36  ;;  %v390_v61 = vrot.slane %v385_v59, %v389_v57 }
  0xd6   :  { %v349_v5 = vmul.f32 %v288_v43, %v253_v2  ;;  %v363_v6 = vadd.f32 %v362_v0, %v348_v63  ;;  %v256_v11 = vmax.f32 %v456_v3, 0.0  ;;  %v357_v39 = vmul.f32 %v328_v33, %v261_v31  ;;  %v343_v48 = vpop.permute.xlu1 %342 }
  0xd7   :  { %v200_v8 = vpop.f32.mrf.mxu0  ;;  %v240_v34 = vpop.f32.mrf.mxu1  ;;  %v264_v43 = vmax.f32 %v468_v26, 0.0 }
  0xd8   :  { %v364_v10 = vadd.f32 %v363_v6, %v349_v5  ;;  %v255_v12 = vmax.f32 %v200_v8, 0.0  ;;  %v352_v19 = vmul.f32 %v303_v58, %v256_v11  ;;  %v263_v40 = vmax.f32 %v240_v34, 0.0 }
  0xd9   :  { %v360_v49 = vmul.f32 %v343_v48, %v264_v43 }
  0xda   :  { %v351_v15 = vmul.f32 %v298_v53, %v255_v12  ;;  %v365_v16 = vadd.f32 %v364_v10, %v350_v9  ;;  %v359_v46 = vmul.f32 %v338_v45, %v263_v40 }
  0xdc   :  { %v366_v20 = vadd.f32 %v365_v16, %v351_v15 }
  0xde   :  { %v367_v24 = vadd.f32 %v366_v20, %v352_v19 }
  0xe0   :  { %v368_v29 = vadd.f32 %v367_v24, %v353_v22 }
  0xe2   :  { %v369_v32 = vadd.f32 %v368_v29, %v354_v27 }
  0xe4   :  { %v370_v37 = vadd.f32 %v369_v32, %v355_v30 }
  0xe6   :  { %v371_v41 = vadd.f32 %v370_v37, %v356_v35 }
  0xe8   :  { %v372_v44 = vadd.f32 %v371_v41, %v357_v39 }
  0xea   :  { %v373_v47 = vadd.f32 %v372_v44, %v358_v42 }
  0xec   :  { %v374_v50 = vadd.f32 %v373_v47, %v359_v46 }
  0xee   :  { %v375_v52 = vadd.f32 %v374_v50, %v360_v49 }
  0xf0   :  { %v376_v53 = vrot.slane %v375_v52, 4 }
  0xf2   :  { %v377_v55 = vadd.f32 %v376_v53, %v375_v52 }
  0xf4   :  { %v378_v56 = vrot.slane %v377_v55, 2 }
  0xf6   :  { %v379_v58 = vadd.f32 %v378_v56, %v377_v55 }
  0xf8   :  { %v380_v60 = vrot.slane %v379_v58, 1 }
  0xfa   :  { %v381_v62 = vadd.f32 %v380_v60, %v379_v58 }
  0xfc   :  { %v391_v63 = vadd.f32 %v390_v61, %v381_v62 }
  0xfe   :  { %392 = vst [vmem:[#allocation3] sm:$0x1] %v391_v63 }
  0xff   :  { %488 = shalt.err (!%p485_p4)
}
 0x100   :  { %402 = dma.vmem_to_hbm [thread:$0]  %s400_s26, 16, %s654_s4, [#allocation4]  }
 0x101   :  { %497 = dma.done.wait [#allocation4], 16  }
 0x102   :  { %498 = vsyncadd [#allocation4], 4294967280 }
 0x103   :  { %406 = vsyncpa [#allocation4], 1 }

</bundles_post_ra>
